<compile_context>
chip_gen: v6e
topology: v6e:2x2x1
jax: 0.10.0
libtpu: 0.0.40
codegen_flags: <defaults>
</compile_context>

<pallas_src>
import math

import numpy as np
import jax
import jax.numpy as jnp
from jax.experimental import pallas as pl
from jax.experimental.pallas import tpu as pltpu


_SLOPE = 0.4
_KH, _KW = 3, 12
_STRIDE_W = 7
_PAD_H = 1
_PAD_W1 = 128
_PAD_W2 = 29


# ----------------------------- fused Pallas kernel --------------------------------

def _make_fused_kernel(B, slope):
    def kernel(x_ref, m1_ref, m2_ref, s_ref, bias_ref, o_ref):
        # x_ref   : (B, H, W0)   input spectrogram (VMEM)
        # m1_ref  : (3, W0, W1)  per-kh width-transform matrices, layer 1 (VMEM)
        # m2_ref  : (3, W1, W2)  per-kh width-transform matrices, layer 2 (VMEM)
        # s_ref   : (2, H, H)    [0]=shift-up (row h <- h+1), [1]=shift-down (row h <- h-1)
        # bias_ref: (2,)         [b1, b2] (SMEM scalars)
        # o_ref   : (B, H, W2)   final output (VMEM)
        b1 = bias_ref[0]
        b2 = bias_ref[1]
        s_up = s_ref[0]     # zero last row  -> drops the out-of-range kh=0 tap at h = H-1
        s_dn = s_ref[1]     # zero first row -> drops the out-of-range kh=2 tap at h = 0

        def dot(lhs, rhs):
            return jnp.dot(lhs, rhs, preferred_element_type=jnp.float32)

        # B is small & static -> unrolled; every batch element is independent.
        for bi in range(B):
            xb = x_ref[bi]                                   # (H, W0)

            # ---- layer 1: ConvTranspose2d(1,1,(3,12),stride=(1,7),padding=(1,128)) + LeakyReLU
            z1 = (dot(dot(s_up, xb), m1_ref[0])              # kh = 0 taps use input row h+1
                  + dot(xb, m1_ref[1])                       # kh = 1 taps use input row h
                  + dot(dot(s_dn, xb), m1_ref[2]))           # kh = 2 taps use input row h-1
            z1 = z1 + b1
            z1 = jnp.where(z1 >= 0.0, z1, slope * z1)        # LeakyReLU(0.4), stays in vregs

            # ---- layer 2: ConvTranspose2d(1,1,(3,12),stride=(1,7),padding=(1,29)) + LeakyReLU
            z2 = (dot(dot(s_up, z1), m2_ref[0])
                  + dot(z1, m2_ref[1])
                  + dot(dot(s_dn, z1), m2_ref[2]))
            z2 = z2 + b2
            o_ref[bi] = jnp.where(z2 >= 0.0, z2, slope * z2)

    return kernel


# --------------------------- parameter preprocessing -------------------------------

def _width_matrices(w2d, w_in, w_out, stride, pad):
    """Fold the stride-`stride` 1-D transposed conv along width into dense matmuls.

    M[kh, iw, j] = w2d[kh, j + pad - stride*iw] if that tap exists, else 0.
    This encodes the polyphase structure (only 1-2 nonzero taps per output phase) and the
    output-side padding/crop, so the kernel never touches zero-upsampled data.
    """
    kh, kw = w2d.shape
    iw = np.arange(w_in)[:, None]
    j = np.arange(w_out)[None, :]
    tap = j + pad - stride * iw                              # (w_in, w_out) kw index
    valid = (tap >= 0) & (tap < kw)
    tap_c = np.clip(tap, 0, kw - 1).astype(np.int32)
    m = jnp.asarray(w2d, jnp.float32)[:, tap_c]              # (kh, w_in, w_out)
    return jnp.where(jnp.asarray(valid)[None, :, :], m, 0.0)


def prepare_params(params, input_shape):
    """One-time (per weights + static input shape) preprocessing for the fused kernel."""
    B, C, H, W0 = input_shape
    if C != 1:
        raise ValueError("SpectrogramConditioner expects a single input channel")
    W1 = (W0 - 1) * _STRIDE_W - 2 * _PAD_W1 + _KW
    W2 = (W1 - 1) * _STRIDE_W - 2 * _PAD_W2 + _KW
    if W1 <= 0 or W2 <= 0:
        raise ValueError(
            f"input width {W0} too small for this transposed-conv stack "
            f"(intermediate widths W1={W1}, W2={W2} must be positive; need W0 >= 37)")

    m1 = _width_matrices(params["w1"][0, 0], W0, W1, _STRIDE_W, _PAD_W1)   # (3, W0, W1)
    m2 = _width_matrices(params["w2"][0, 0], W1, W2, _STRIDE_W, _PAD_W2)   # (3, W1, W2)

    shift = np.zeros((2, H, H), np.float32)
    shift[0, np.arange(H - 1), np.arange(1, H)] = 1.0   # up:   out[h] = in[h+1]
    shift[1, np.arange(1, H), np.arange(H - 1)] = 1.0   # down: out[h] = in[h-1]

    bias = jnp.concatenate([params["b1"], params["b2"]]).astype(jnp.float32)  # (2,)
    return m1, m2, jnp.asarray(shift), bias


# --------------------------- full module forward ----------------------------

@jax.jit
def spectrogram_conditioner_forward(spectrogram, m1, m2, shift, bias):
    """Forward pass. spectrogram: (B, 1, H, W) float32 -> (B, H, W_out2) float32."""
    B, C, H, W0 = spectrogram.shape
    W2 = m2.shape[2]
    x = spectrogram.reshape(B, H, W0)            # drop the singleton channel (free reshape)

    return pl.pallas_call(
        _make_fused_kernel(B, _SLOPE),
        out_shape=jax.ShapeDtypeStruct((B, H, W2), jnp.float32),
        in_specs=[
            pl.BlockSpec(memory_space=pltpu.MemorySpace.VMEM),   # x
            pl.BlockSpec(memory_space=pltpu.MemorySpace.VMEM),   # m1
            pl.BlockSpec(memory_space=pltpu.MemorySpace.VMEM),   # m2
            pl.BlockSpec(memory_space=pltpu.MemorySpace.VMEM),   # shift matrices
            pl.BlockSpec(memory_space=pltpu.MemorySpace.SMEM),   # biases
        ],
        out_specs=pl.BlockSpec(memory_space=pltpu.MemorySpace.VMEM),
    )(x, m1, m2, shift, bias)


def init_params(key):
    k1, k2, k3, k4 = jax.random.split(key, 4)
    fan_in = 1 * _KH * _KW
    bound = 1.0 / math.sqrt(fan_in)
    return {
        "w1": jax.random.uniform(k1, (1, 1, _KH, _KW), jnp.float32, -bound, bound),
        "b1": jax.random.uniform(k2, (1,), jnp.float32, -bound, bound),
        "w2": jax.random.uniform(k3, (1, 1, _KH, _KW), jnp.float32, -bound, bound),
        "b2": jax.random.uniform(k4, (1,), jnp.float32, -bound, bound),
    }


# ------------------------------ numpy reference ------------------------------

def _ref_conv_transpose2d(x, w, b, stride, pad):
    B, Cin, H, W = x.shape
    _, Cout, Kh, Kw = w.shape
    sh, sw = stride
    ph, pw = pad
    Hf = (H - 1) * sh + Kh
    Wf = (W - 1) * sw + Kw
    full = np.zeros((B, Cout, Hf, Wf), dtype=np.float64)
    for bi in range(B):
        for ci in range(Cin):
            for h in range(H):
                for wv in range(W):
                    full[bi, :, h * sh:h * sh + Kh, wv * sw:wv * sw + Kw] += (
                        x[bi, ci, h, wv] * w[ci]
                    )
    return full[:, :, ph:Hf - ph, pw:Wf - pw] + b.reshape(1, -1, 1, 1)


def _ref_forward(x, params):
    slope = _SLOPE
    y = _ref_conv_transpose2d(x, np.asarray(params["w1"], np.float64),
                              np.asarray(params["b1"], np.float64), (1, 7), (1, _PAD_W1))
    y = np.where(y >= 0, y, slope * y)
    y = _ref_conv_transpose2d(y, np.asarray(params["w2"], np.float64),
                              np.asarray(params["b2"], np.float64), (1, 7), (1, _PAD_W2))
    y = np.where(y >= 0, y, slope * y)
    return np.squeeze(y, 1)


# ----------------------------------- main ------------------------------------

if __name__ == "__main__":
    # W must be >= 37 so the padding=128 transposed conv has positive output width.
    B, H, W = 2, 8, 40
    spectrogram = jax.random.normal(jax.random.PRNGKey(0), (B, 1, H, W), dtype=jnp.float32)
    params = init_params(jax.random.PRNGKey(42))

    m1, m2, shift, bias = prepare_params(params, spectrogram.shape)
    out = spectrogram_conditioner_forward(spectrogram, m1, m2, shift, bias)
    out = jax.block_until_ready(out)

    ref = _ref_forward(np.asarray(spectrogram, np.float64), params)
    assert out.shape == ref.shape, (out.shape, ref.shape)          # (2, 8, 150)
    # Tolerance leaves headroom for the MXU possibly contracting f32 operands at reduced
    # (bf16) precision; structural/indexing bugs would produce O(0.1-1) errors.
    np.testing.assert_allclose(np.asarray(out), ref, rtol=5e-3, atol=5e-3)

    print("KERNEL_OK")
</pallas_src>

<mosaic_0001>
module attributes {stable_mosaic.version = 11 : i64} {
  func.func @kernel(%arg0: memref<2x8x40xf32, #tpu.memory_space<vmem>>, %arg1: memref<3x40x29xf32, #tpu.memory_space<vmem>>, %arg2: memref<3x29x150xf32, #tpu.memory_space<vmem>>, %arg3: memref<2x8x8xf32, #tpu.memory_space<vmem>>, %arg4: memref<2xf32, #tpu.memory_space<smem>>, %arg5: memref<2x8x150xf32, #tpu.memory_space<vmem>>) attributes {dimension_semantics = [], scalar_prefetch = 0 : i64, scratch_operands = 0 : i64, tpu.core_type = #tpu.core_type<tc>} {
    %c0 = arith.constant 0 : index
    %0 = memref.load %arg4[%c0] : memref<2xf32, #tpu.memory_space<smem>>
    %c1 = arith.constant 1 : index
    %1 = memref.load %arg4[%c1] : memref<2xf32, #tpu.memory_space<smem>>
    %c0_0 = arith.constant 0 : index
    %c0_1 = arith.constant 0 : index
    %c0_2 = arith.constant 0 : index
    %2 = vector.load %arg3[%c0_0, %c0_1, %c0_2] : memref<2x8x8xf32, #tpu.memory_space<vmem>>, vector<1x8x8xf32>
    %3 = vector.shape_cast %2 : vector<1x8x8xf32> to vector<8x8xf32>
    %c1_3 = arith.constant 1 : index
    %c0_4 = arith.constant 0 : index
    %c0_5 = arith.constant 0 : index
    %4 = vector.load %arg3[%c1_3, %c0_4, %c0_5] : memref<2x8x8xf32, #tpu.memory_space<vmem>>, vector<1x8x8xf32>
    %5 = vector.shape_cast %4 : vector<1x8x8xf32> to vector<8x8xf32>
    %c0_6 = arith.constant 0 : index
    %c0_7 = arith.constant 0 : index
    %c0_8 = arith.constant 0 : index
    %6 = vector.load %arg0[%c0_6, %c0_7, %c0_8] : memref<2x8x40xf32, #tpu.memory_space<vmem>>, vector<1x8x40xf32>
    %7 = vector.shape_cast %6 : vector<1x8x40xf32> to vector<8x40xf32>
    %cst = arith.constant dense<0.000000e+00> : vector<8x40xf32>
    %8 = tpu.matmul %3, %7, %cst {dimension_numbers = #tpu.dot_dimension_numbers<[1], [0], [0], [1], [0, 0, 1, 1], [], []>} : vector<8x8xf32>, vector<8x40xf32>, vector<8x40xf32> -> vector<8x40xf32>
    %c0_9 = arith.constant 0 : index
    %c0_10 = arith.constant 0 : index
    %c0_11 = arith.constant 0 : index
    %9 = vector.load %arg1[%c0_9, %c0_10, %c0_11] : memref<3x40x29xf32, #tpu.memory_space<vmem>>, vector<1x40x29xf32>
    %10 = vector.shape_cast %9 : vector<1x40x29xf32> to vector<40x29xf32>
    %cst_12 = arith.constant dense<0.000000e+00> : vector<8x29xf32>
    %11 = tpu.matmul %8, %10, %cst_12 {dimension_numbers = #tpu.dot_dimension_numbers<[1], [0], [0], [1], [0, 0, 1, 1], [], []>} : vector<8x40xf32>, vector<40x29xf32>, vector<8x29xf32> -> vector<8x29xf32>
    %c1_13 = arith.constant 1 : index
    %c0_14 = arith.constant 0 : index
    %c0_15 = arith.constant 0 : index
    %12 = vector.load %arg1[%c1_13, %c0_14, %c0_15] : memref<3x40x29xf32, #tpu.memory_space<vmem>>, vector<1x40x29xf32>
    %13 = vector.shape_cast %12 : vector<1x40x29xf32> to vector<40x29xf32>
    %cst_16 = arith.constant dense<0.000000e+00> : vector<8x29xf32>
    %14 = tpu.matmul %7, %13, %cst_16 {dimension_numbers = #tpu.dot_dimension_numbers<[1], [0], [0], [1], [0, 0, 1, 1], [], []>} : vector<8x40xf32>, vector<40x29xf32>, vector<8x29xf32> -> vector<8x29xf32>
    %15 = arith.addf %11, %14 : vector<8x29xf32>
    %cst_17 = arith.constant dense<0.000000e+00> : vector<8x40xf32>
    %16 = tpu.matmul %5, %7, %cst_17 {dimension_numbers = #tpu.dot_dimension_numbers<[1], [0], [0], [1], [0, 0, 1, 1], [], []>} : vector<8x8xf32>, vector<8x40xf32>, vector<8x40xf32> -> vector<8x40xf32>
    %c2 = arith.constant 2 : index
    %c0_18 = arith.constant 0 : index
    %c0_19 = arith.constant 0 : index
    %17 = vector.load %arg1[%c2, %c0_18, %c0_19] : memref<3x40x29xf32, #tpu.memory_space<vmem>>, vector<1x40x29xf32>
    %18 = vector.shape_cast %17 : vector<1x40x29xf32> to vector<40x29xf32>
    %cst_20 = arith.constant dense<0.000000e+00> : vector<8x29xf32>
    %19 = tpu.matmul %16, %18, %cst_20 {dimension_numbers = #tpu.dot_dimension_numbers<[1], [0], [0], [1], [0, 0, 1, 1], [], []>} : vector<8x40xf32>, vector<40x29xf32>, vector<8x29xf32> -> vector<8x29xf32>
    %20 = arith.addf %15, %19 : vector<8x29xf32>
    %21 = vector.broadcast %0 : f32 to vector<8x29xf32>
    %22 = arith.addf %20, %21 : vector<8x29xf32>
    %cst_21 = arith.constant 0.000000e+00 : f32
    %23 = vector.broadcast %cst_21 : f32 to vector<8x29xf32>
    %24 = arith.cmpf oge, %22, %23 : vector<8x29xf32>
    %cst_22 = arith.constant 4.000000e-01 : f32
    %25 = vector.broadcast %cst_22 : f32 to vector<8x29xf32>
    %26 = arith.mulf %25, %22 : vector<8x29xf32>
    %27 = arith.select %24, %22, %26 : vector<8x29xi1>, vector<8x29xf32>
    %cst_23 = arith.constant dense<0.000000e+00> : vector<8x29xf32>
    %28 = tpu.matmul %3, %27, %cst_23 {dimension_numbers = #tpu.dot_dimension_numbers<[1], [0], [0], [1], [0, 0, 1, 1], [], []>} : vector<8x8xf32>, vector<8x29xf32>, vector<8x29xf32> -> vector<8x29xf32>
    %c0_24 = arith.constant 0 : index
    %c0_25 = arith.constant 0 : index
    %c0_26 = arith.constant 0 : index
    %29 = vector.load %arg2[%c0_24, %c0_25, %c0_26] : memref<3x29x150xf32, #tpu.memory_space<vmem>>, vector<1x29x150xf32>
    %30 = vector.shape_cast %29 : vector<1x29x150xf32> to vector<29x150xf32>
    %cst_27 = arith.constant dense<0.000000e+00> : vector<8x150xf32>
    %31 = tpu.matmul %28, %30, %cst_27 {dimension_numbers = #tpu.dot_dimension_numbers<[1], [0], [0], [1], [0, 0, 1, 1], [], []>} : vector<8x29xf32>, vector<29x150xf32>, vector<8x150xf32> -> vector<8x150xf32>
    %c1_28 = arith.constant 1 : index
    %c0_29 = arith.constant 0 : index
    %c0_30 = arith.constant 0 : index
    %32 = vector.load %arg2[%c1_28, %c0_29, %c0_30] : memref<3x29x150xf32, #tpu.memory_space<vmem>>, vector<1x29x150xf32>
    %33 = vector.shape_cast %32 : vector<1x29x150xf32> to vector<29x150xf32>
    %cst_31 = arith.constant dense<0.000000e+00> : vector<8x150xf32>
    %34 = tpu.matmul %27, %33, %cst_31 {dimension_numbers = #tpu.dot_dimension_numbers<[1], [0], [0], [1], [0, 0, 1, 1], [], []>} : vector<8x29xf32>, vector<29x150xf32>, vector<8x150xf32> -> vector<8x150xf32>
    %35 = arith.addf %31, %34 : vector<8x150xf32>
    %cst_32 = arith.constant dense<0.000000e+00> : vector<8x29xf32>
    %36 = tpu.matmul %5, %27, %cst_32 {dimension_numbers = #tpu.dot_dimension_numbers<[1], [0], [0], [1], [0, 0, 1, 1], [], []>} : vector<8x8xf32>, vector<8x29xf32>, vector<8x29xf32> -> vector<8x29xf32>
    %c2_33 = arith.constant 2 : index
    %c0_34 = arith.constant 0 : index
    %c0_35 = arith.constant 0 : index
    %37 = vector.load %arg2[%c2_33, %c0_34, %c0_35] : memref<3x29x150xf32, #tpu.memory_space<vmem>>, vector<1x29x150xf32>
    %38 = vector.shape_cast %37 : vector<1x29x150xf32> to vector<29x150xf32>
    %cst_36 = arith.constant dense<0.000000e+00> : vector<8x150xf32>
    %39 = tpu.matmul %36, %38, %cst_36 {dimension_numbers = #tpu.dot_dimension_numbers<[1], [0], [0], [1], [0, 0, 1, 1], [], []>} : vector<8x29xf32>, vector<29x150xf32>, vector<8x150xf32> -> vector<8x150xf32>
    %40 = arith.addf %35, %39 : vector<8x150xf32>
    %41 = vector.broadcast %1 : f32 to vector<8x150xf32>
    %42 = arith.addf %40, %41 : vector<8x150xf32>
    %cst_37 = arith.constant 0.000000e+00 : f32
    %43 = vector.broadcast %cst_37 : f32 to vector<8x150xf32>
    %44 = arith.cmpf oge, %42, %43 : vector<8x150xf32>
    %cst_38 = arith.constant 4.000000e-01 : f32
    %45 = vector.broadcast %cst_38 : f32 to vector<8x150xf32>
    %46 = arith.mulf %45, %42 : vector<8x150xf32>
    %47 = arith.select %44, %42, %46 : vector<8x150xi1>, vector<8x150xf32>
    %c0_39 = arith.constant 0 : index
    %c0_40 = arith.constant 0 : index
    %c0_41 = arith.constant 0 : index
    %48 = vector.load %arg5[%c0_39, %c0_40, %c0_41] : memref<2x8x150xf32, #tpu.memory_space<vmem>>, vector<1x8x150xf32>
    %49 = vector.shape_cast %48 : vector<1x8x150xf32> to vector<8x150xf32>
    %50 = vector.shape_cast %47 : vector<8x150xf32> to vector<1x8x150xf32>
    tpu.vector_store %arg5[%c0_39, %c0_40, %c0_41], %50 {strides = array<i32>} : memref<2x8x150xf32, #tpu.memory_space<vmem>>, vector<1x8x150xf32>,
    %c1_42 = arith.constant 1 : index
    %c0_43 = arith.constant 0 : index
    %c0_44 = arith.constant 0 : index
    %51 = vector.load %arg0[%c1_42, %c0_43, %c0_44] : memref<2x8x40xf32, #tpu.memory_space<vmem>>, vector<1x8x40xf32>
    %52 = vector.shape_cast %51 : vector<1x8x40xf32> to vector<8x40xf32>
    %cst_45 = arith.constant dense<0.000000e+00> : vector<8x40xf32>
    %53 = tpu.matmul %3, %52, %cst_45 {dimension_numbers = #tpu.dot_dimension_numbers<[1], [0], [0], [1], [0, 0, 1, 1], [], []>} : vector<8x8xf32>, vector<8x40xf32>, vector<8x40xf32> -> vector<8x40xf32>
    %c0_46 = arith.constant 0 : index
    %c0_47 = arith.constant 0 : index
    %c0_48 = arith.constant 0 : index
    %54 = vector.load %arg1[%c0_46, %c0_47, %c0_48] : memref<3x40x29xf32, #tpu.memory_space<vmem>>, vector<1x40x29xf32>
    %55 = vector.shape_cast %54 : vector<1x40x29xf32> to vector<40x29xf32>
    %cst_49 = arith.constant dense<0.000000e+00> : vector<8x29xf32>
    %56 = tpu.matmul %53, %55, %cst_49 {dimension_numbers = #tpu.dot_dimension_numbers<[1], [0], [0], [1], [0, 0, 1, 1], [], []>} : vector<8x40xf32>, vector<40x29xf32>, vector<8x29xf32> -> vector<8x29xf32>
    %c1_50 = arith.constant 1 : index
    %c0_51 = arith.constant 0 : index
    %c0_52 = arith.constant 0 : index
    %57 = vector.load %arg1[%c1_50, %c0_51, %c0_52] : memref<3x40x29xf32, #tpu.memory_space<vmem>>, vector<1x40x29xf32>
    %58 = vector.shape_cast %57 : vector<1x40x29xf32> to vector<40x29xf32>
    %cst_53 = arith.constant dense<0.000000e+00> : vector<8x29xf32>
    %59 = tpu.matmul %52, %58, %cst_53 {dimension_numbers = #tpu.dot_dimension_numbers<[1], [0], [0], [1], [0, 0, 1, 1], [], []>} : vector<8x40xf32>, vector<40x29xf32>, vector<8x29xf32> -> vector<8x29xf32>
    %60 = arith.addf %56, %59 : vector<8x29xf32>
    %cst_54 = arith.constant dense<0.000000e+00> : vector<8x40xf32>
    %61 = tpu.matmul %5, %52, %cst_54 {dimension_numbers = #tpu.dot_dimension_numbers<[1], [0], [0], [1], [0, 0, 1, 1], [], []>} : vector<8x8xf32>, vector<8x40xf32>, vector<8x40xf32> -> vector<8x40xf32>
    %c2_55 = arith.constant 2 : index
    %c0_56 = arith.constant 0 : index
    %c0_57 = arith.constant 0 : index
    %62 = vector.load %arg1[%c2_55, %c0_56, %c0_57] : memref<3x40x29xf32, #tpu.memory_space<vmem>>, vector<1x40x29xf32>
    %63 = vector.shape_cast %62 : vector<1x40x29xf32> to vector<40x29xf32>
    %cst_58 = arith.constant dense<0.000000e+00> : vector<8x29xf32>
    %64 = tpu.matmul %61, %63, %cst_58 {dimension_numbers = #tpu.dot_dimension_numbers<[1], [0], [0], [1], [0, 0, 1, 1], [], []>} : vector<8x40xf32>, vector<40x29xf32>, vector<8x29xf32> -> vector<8x29xf32>
    %65 = arith.addf %60, %64 : vector<8x29xf32>
    %66 = vector.broadcast %0 : f32 to vector<8x29xf32>
    %67 = arith.addf %65, %66 : vector<8x29xf32>
    %cst_59 = arith.constant 0.000000e+00 : f32
    %68 = vector.broadcast %cst_59 : f32 to vector<8x29xf32>
    %69 = arith.cmpf oge, %67, %68 : vector<8x29xf32>
    %cst_60 = arith.constant 4.000000e-01 : f32
    %70 = vector.broadcast %cst_60 : f32 to vector<8x29xf32>
    %71 = arith.mulf %70, %67 : vector<8x29xf32>
    %72 = arith.select %69, %67, %71 : vector<8x29xi1>, vector<8x29xf32>
    %cst_61 = arith.constant dense<0.000000e+00> : vector<8x29xf32>
    %73 = tpu.matmul %3, %72, %cst_61 {dimension_numbers = #tpu.dot_dimension_numbers<[1], [0], [0], [1], [0, 0, 1, 1], [], []>} : vector<8x8xf32>, vector<8x29xf32>, vector<8x29xf32> -> vector<8x29xf32>
    %c0_62 = arith.constant 0 : index
    %c0_63 = arith.constant 0 : index
    %c0_64 = arith.constant 0 : index
    %74 = vector.load %arg2[%c0_62, %c0_63, %c0_64] : memref<3x29x150xf32, #tpu.memory_space<vmem>>, vector<1x29x150xf32>
    %75 = vector.shape_cast %74 : vector<1x29x150xf32> to vector<29x150xf32>
    %cst_65 = arith.constant dense<0.000000e+00> : vector<8x150xf32>
    %76 = tpu.matmul %73, %75, %cst_65 {dimension_numbers = #tpu.dot_dimension_numbers<[1], [0], [0], [1], [0, 0, 1, 1], [], []>} : vector<8x29xf32>, vector<29x150xf32>, vector<8x150xf32> -> vector<8x150xf32>
    %c1_66 = arith.constant 1 : index
    %c0_67 = arith.constant 0 : index
    %c0_68 = arith.constant 0 : index
    %77 = vector.load %arg2[%c1_66, %c0_67, %c0_68] : memref<3x29x150xf32, #tpu.memory_space<vmem>>, vector<1x29x150xf32>
    %78 = vector.shape_cast %77 : vector<1x29x150xf32> to vector<29x150xf32>
    %cst_69 = arith.constant dense<0.000000e+00> : vector<8x150xf32>
    %79 = tpu.matmul %72, %78, %cst_69 {dimension_numbers = #tpu.dot_dimension_numbers<[1], [0], [0], [1], [0, 0, 1, 1], [], []>} : vector<8x29xf32>, vector<29x150xf32>, vector<8x150xf32> -> vector<8x150xf32>
    %80 = arith.addf %76, %79 : vector<8x150xf32>
    %cst_70 = arith.constant dense<0.000000e+00> : vector<8x29xf32>
    %81 = tpu.matmul %5, %72, %cst_70 {dimension_numbers = #tpu.dot_dimension_numbers<[1], [0], [0], [1], [0, 0, 1, 1], [], []>} : vector<8x8xf32>, vector<8x29xf32>, vector<8x29xf32> -> vector<8x29xf32>
    %c2_71 = arith.constant 2 : index
    %c0_72 = arith.constant 0 : index
    %c0_73 = arith.constant 0 : index
    %82 = vector.load %arg2[%c2_71, %c0_72, %c0_73] : memref<3x29x150xf32, #tpu.memory_space<vmem>>, vector<1x29x150xf32>
    %83 = vector.shape_cast %82 : vector<1x29x150xf32> to vector<29x150xf32>
    %cst_74 = arith.constant dense<0.000000e+00> : vector<8x150xf32>
    %84 = tpu.matmul %81, %83, %cst_74 {dimension_numbers = #tpu.dot_dimension_numbers<[1], [0], [0], [1], [0, 0, 1, 1], [], []>} : vector<8x29xf32>, vector<29x150xf32>, vector<8x150xf32> -> vector<8x150xf32>
    %85 = arith.addf %80, %84 : vector<8x150xf32>
    %86 = vector.broadcast %1 : f32 to vector<8x150xf32>
    %87 = arith.addf %85, %86 : vector<8x150xf32>
    %cst_75 = arith.constant 0.000000e+00 : f32
    %88 = vector.broadcast %cst_75 : f32 to vector<8x150xf32>
    %89 = arith.cmpf oge, %87, %88 : vector<8x150xf32>
    %cst_76 = arith.constant 4.000000e-01 : f32
    %90 = vector.broadcast %cst_76 : f32 to vector<8x150xf32>
    %91 = arith.mulf %90, %87 : vector<8x150xf32>
    %92 = arith.select %89, %87, %91 : vector<8x150xi1>, vector<8x150xf32>
    %c1_77 = arith.constant 1 : index
    %c0_78 = arith.constant 0 : index
    %c0_79 = arith.constant 0 : index
    %93 = vector.load %arg5[%c1_77, %c0_78, %c0_79] : memref<2x8x150xf32, #tpu.memory_space<vmem>>, vector<1x8x150xf32>
    %94 = vector.shape_cast %93 : vector<1x8x150xf32> to vector<8x150xf32>
    %95 = vector.shape_cast %92 : vector<8x150xf32> to vector<1x8x150xf32>
    tpu.vector_store %arg5[%c1_77, %c0_78, %c0_79], %95 {strides = array<i32>} : memref<2x8x150xf32, #tpu.memory_space<vmem>>, vector<1x8x150xf32>,
    return
  }
}

</mosaic_0001>

<bundles_post_ra>
// kernel: spectrogram_conditioner_forward.1
= control target key start
LH: loop header
LB: loop body
LE: loop exit
PB: predicated region body
PF: predicated region fallthrough
CT: control target
= control target key end

     0   :  { %10 = vsyncpa [#allocation3], 0  ;;  %s2457_s0 = inlined_call_operand.vmem [shape: f32[2,8,40], index: 0, kind: input, shape index: {}]   ;;  %s2458_s1 = inlined_call_operand.vmem [shape: f32[3,40,29], index: 1, kind: input, shape index: {}]   ;;  %s2459_s2 = inlined_call_operand.vmem [shape: f32[3,29,150], index: 2, kind: input, shape index: {}]   ;;  %s2460_s3 = inlined_call_operand.hbm [shape: f32[2,8,8], index: 3, kind: input, shape index: {}]   ;;  %s2461_s4 = inlined_call_operand.vmem [shape: f32[2], index: 4, kind: input, shape index: {}]   ;;  %s2462_s5 = inlined_call_operand.hbm [shape: f32[2,8,150], index: 5, kind: output, shape index: {}]  }
   0x1   :  { %11 = vsyncpa [#allocation5], 0 }
   0x2   :  { %12 = vsyncpa [#allocation4], 0  ;;  %s2005_s18 = smov [#allocation2]   ;;  %s37_s22 = sshll.u32 %s2461_s4, 4  ;;  %s38_s22 = int_to_ptr.vmem [resolvable:$true] %s37_s22 }
   0x3   :  { %s24_s19 = sshll.u32 %s2005_s18, 4  ;;  %s25_s19 = int_to_ptr.vmem [resolvable:$true] %s24_s19 }
   0x4   :  { %s1955_s23 = scalar_lea.vmem %s25_s19, 256  ;;  %p1960_p1 = scmp.lt.s32.totalorder %s25_s19, %s25_s19 }
   0x5   :  { %p1956_p0 = scmp.ne.s32.totalorder %s25_s19, %s1955_s23  ;;  %p1961_p2 = scmp.lt.s32.totalorder %s1955_s23, %s1955_s23 }
   0x7   :  { %p1962_p3 = por %p1961_p2, %p1960_p1 }
   0x9   :  { %p1963_p4 = pnand %p1962_p3, %p1956_p0 }
   0xb   :  { %1966 = shalt.err (!%p1963_p4)
}
   0xc   :  { %s2006_s24 = smov 128   ;;  %s2007_s25 = smov 8  }
   0xd   :  { %30 = dma.hbm_to_vmem [thread:$0]  %s2460_s3, 256, %s25_s19, [#allocation3], %s2006_s24, %s2006_s24, %s2007_s25  }
   0xe   :  { %s1967_s28 = scalar_lea.vmem %s38_s22, 16  ;;  %p1972_p6 = scmp.lt.s32.totalorder %s38_s22, %s38_s22 }
   0xf   :  { %p1968_p5 = scmp.ne.s32.totalorder %s38_s22, %s1967_s28  ;;  %p1973_p7 = scmp.lt.s32.totalorder %s1967_s28, %s1967_s28 }
  0x11   :  { %p1974_p8 = por %p1973_p7, %p1972_p6 }
  0x13   :  { %p1975_p9 = pnand %p1974_p8, %p1968_p5 }
  0x15   :  { %1978 = shalt.err (!%p1975_p9)
}
  0x16   :  { %s2008_s4 = smov [#allocation6]  }
  0x17   :  { %40 = dma.vmem_to_smem %s38_s22, 16, %s2008_s4, [#allocation5]  }
  0x18   :  { %1999 = dma.done.wait [#allocation3], 256  }
  0x19   :  { %2000 = vsyncadd [#allocation3], 4294967040 }
  0x1a   :  { %2001 = dma.done.wait [#allocation5], 16  }
  0x1b   :  { %2002 = vsyncadd [#allocation5], 4294967280 }
  0x1c   :  { %47 = sfence }
  0x1d   :  { %v53_v0 = vld [vmem:[%s2457_s0] sm:$0xff]  ;;  %vm54_vm0 = vcmask 64512   ;;  %v2009_v2 = vmov 0.0   ;;  %vm2010_vm1 = vmmov 0   ;;  %v2061_v3 = vld [vmem:[%s2458_s1 + $0x48] sm:$0xff]  ;;  %v2080_v6 = vld [vmem:[%s2458_s1 + $0x18] sm:$0xff] }
  0x1e   :  { %v2053_v1 = vld [vmem:[#allocation2] sm:$0xff]  ;;  %1820 = vmatprep.subr.mxu0 %v2009_v2  ;;  %1822 = vmatprep.mubr.msk.f32.mxu0 %vm2010_vm1, %v2009_v2  ;;  %v2089_v7 = vld [vmem:[%s2458_s1 + $0x38] sm:$0xff]  ;;  %v2094_v8 = vld [vmem:[%s2458_s1 + $0x10] sm:$0xff]  ;;  %vm139_vm2 = vcmask 326656   ;;  %vm535_vm3 = vcmask 1044480   ;;  %s2223_s21 = sld [smem:[#allocation6]] }
  0x1f   :  { %v2066_v4 = vld [vmem:[%s2458_s1 + $0x20] sm:$0xff]  ;;  %1821 = vmatpush3.msra.mxu0 %v53_v0  ;;  %1825 = vmatprep.subr.mxu1 %v2009_v2  ;;  %v2103_v9 = vld [vmem:[%s2458_s1 + $0x30] sm:$0xff]  ;;  %v2108_v10 = vld [vmem:[%s2458_s1 + $0x8] sm:$0xff]  ;;  %vm531_vm5 = vcmask 236544   ;;  %s1682_s7 = sld [smem:[#allocation6 + $0x1]]  ;;  %vm864_vm8 = vcmask 179200  }
  0x20   :  { %1823 = vmatmul.mubr.msk.f32.vlgmr.msra.gmra.mxu0 %vm54_vm0, %v2053_v1  ;;  %1838 = vmatprep.subr.mxu0 %v2009_v2  ;;  %v2075_v5 = vld [vmem:[%s2458_s1 + $0x40] sm:$0xff]  ;;  %v2125_v11 = vld [vmem:[%s2458_s1 + $0x28] sm:$0xff]  ;;  %v2148_v16 = vld [vmem:[%s2458_s1 + $0x70] sm:$0xff] }
  0x21   :  { %1826 = vmatpush3.msra.mxu1 %v2061_v3  ;;  %1839 = vmatpush3.msra.mxu0 %v2066_v4  ;;  %v2130_v12 = vld [vmem:[%s2458_s1] sm:$0xff]  ;;  %v2142_v15 = vld [vmem:[#allocation2 + $0x8] sm:$0xff]  ;;  %v2173_v20 = vld [vmem:[%s2458_s1 + $0x58] sm:$0xff] }
  0x22   :  { %1827 = vmatprep.subr.mxu1 %v2009_v2  ;;  %1840 = vmatprep.subr.mxu0 %v2009_v2  ;;  %v2155_v17 = vld [vmem:[%s2458_s1 + $0x68] sm:$0xff]  ;;  %v2166_v18 = vld [vmem:[%s2458_s1 + $0x60] sm:$0xff]  ;;  %v2180_v22 = vld [vmem:[%s2458_s1 + $0x50] sm:$0xff] }
  0x23   :  { %1828 = vmatpush3.msra.mxu1 %v2075_v5  ;;  %1841 = vmatpush3.msra.mxu0 %v2080_v6  ;;  %v521_v27 = vld [vmem:[%s2459_s2 + $0x38] sm:$0x1f]  ;;  %v520_v28 = vld [vmem:[%s2459_s2 + $0x30] sm:$0x1f]  ;;  %v2194_v29 = vld [vmem:[%s2459_s2 + $0x28] sm:$0xff] }
  0x24   :  { %1829 = vmatprep.subr.mxu1 %v2009_v2  ;;  %1842 = vmatprep.subr.mxu0 %v2009_v2  ;;  %v2200_v30 = vld [vmem:[%s2459_s2 + $0x20] sm:$0xff]  ;;  %v2206_v31 = vld [vmem:[%s2459_s2 + $0x18] sm:$0xff]  ;;  %v2212_v32 = vld [vmem:[%s2459_s2 + $0x10] sm:$0xff]  ;;  %v439_v36 = vstv %s2223_s21 }
  0x25   :  { %1830 = vmatpush3.msra.mxu1 %v2089_v7  ;;  %1843 = vmatpush3.msra.mxu0 %v2094_v8  ;;  %v2218_v33 = vld [vmem:[%s2459_s2 + $0x8] sm:$0xff]  ;;  %v1706_v41 = vld [vmem:[%s2459_s2 + $0x78] sm:$0x1f]  ;;  %v1705_v43 = vld [vmem:[%s2459_s2 + $0x70] sm:$0x1f] }
  0x26   :  { %1831 = vmatprep.subr.mxu1 %v2009_v2  ;;  %1844 = vmatprep.subr.mxu0 %v2009_v2  ;;  %v2237_v44 = vld [vmem:[%s2459_s2 + $0x68] sm:$0xff]  ;;  %v2245_v45 = vld [vmem:[%s2459_s2 + $0x60] sm:$0xff]  ;;  %v2251_v46 = vld [vmem:[%s2459_s2 + $0x58] sm:$0xff] }
  0x27   :  { %1832 = vmatpush3.msra.mxu1 %v2103_v9  ;;  %1845 = vmatpush3.msra.mxu0 %v2108_v10  ;;  %v2258_v47 = vld [vmem:[%s2459_s2 + $0x50] sm:$0xff]  ;;  %v2264_v48 = vld [vmem:[%s2459_s2 + $0x48] sm:$0xff]  ;;  %v2270_v49 = vld [vmem:[%s2459_s2 + $0x40] sm:$0xff] }
  0x28   :  { %1833 = vmatprep.subr.mxu1 %v2009_v2  ;;  %1846 = vmatprep.subr.mxu0 %v2009_v2  ;;  %v1725_v50 = vld [vmem:[%s2457_s0 + $0x8] sm:$0xff]  ;;  %v2313_v51 = vld [vmem:[%s2459_s2] sm:$0xff]  ;;  %v1721_v52 = vld [vmem:[%s2459_s2 + $0xb8] sm:$0x1f] }
  0x29   :  { %1835 = vmatprep.mubr.msk.f32.mxu1 %vm2010_vm1, %v2009_v2  ;;  %1848 = vmatprep.mubr.msk.f32.mxu0 %vm2010_vm1, %v2009_v2  ;;  %v1720_v53 = vld [vmem:[%s2459_s2 + $0xb0] sm:$0x1f]  ;;  %v2326_v55 = vld [vmem:[%s2459_s2 + $0xa8] sm:$0xff]  ;;  %v2332_v56 = vld [vmem:[%s2459_s2 + $0xa0] sm:$0xff] }
  0x2a   :  { %1834 = vmatpush3.msra.mxu1 %v2125_v11  ;;  %1847 = vmatpush3.msra.mxu0 %v2130_v12  ;;  %v2338_v58 = vld [vmem:[%s2459_s2 + $0x98] sm:$0xff]  ;;  %v2345_v59 = vld [vmem:[%s2459_s2 + $0x90] sm:$0xff]  ;;  %v2351_v60 = vld [vmem:[%s2459_s2 + $0x88] sm:$0xff] }
  0x2b   :  { %1836 = vmatmul.mubr.msk.f32.vlgmr.msra.gmra.mxu1 %vm139_vm2, %v53_v0  ;;  %1851 = vmatprep.subr.mxu0 %v2009_v2  ;;  %v2357_v61 = vld [vmem:[%s2459_s2 + $0x80] sm:$0xff] }
  0x2c   :  { %1869 = vmatprep.subr.mxu1 %v2009_v2  ;;  %1871 = vmatprep.mubr.msk.f32.mxu1 %vm2010_vm1, %v2009_v2 }
  0xe0   :  { %v124_v13 = vpop.f32.mrf.mxu0 }
  0xe1   :  { %1849 = vmatmul.mubr.msk.f32.vlgmr.msra.gmra.mxu0 %vm139_vm2, %v124_v13 }
  0xe2   :  { %v1824_v14 = vpop.f32.mrf.mxu0  ;;  %1852 = vmatpush3.msra.mxu0 %v53_v0  ;;  %1853 = vmatprep.mubr.msk.f32.mxu0 %vm2010_vm1, %v2009_v2 }
  0xe3   :  { %1856 = vmatprep.subr.mxu0 %v2009_v2 }
  0xe5   :  { %1854 = vmatmul.mubr.msk.f32.vlgmr.msra.gmra.mxu0 %vm54_vm0, %v2142_v15 }
  0xe6   :  { %1857 = vmatpush3.msra.mxu0 %v2148_v16  ;;  %1866 = vmatprep.mubr.msk.f32.mxu0 %vm2010_vm1, %v2009_v2 }
  0xe7   :  { %1858 = vmatprep.subr.mxu0 %v2009_v2 }
  0xe8   :  { %1859 = vmatpush3.msra.mxu0 %v2155_v17 }
  0xe9   :  { %1860 = vmatprep.subr.mxu0 %v2009_v2 }
  0xea   :  { %1861 = vmatpush3.msra.mxu0 %v2166_v18 }
  0xeb   :  { %v209_v19 = vpop.f32.mrf.mxu1  ;;  %1862 = vmatprep.subr.mxu0 %v2009_v2 }
  0xec   :  { %1863 = vmatpush3.msra.mxu0 %v2173_v20 }
  0xed   :  { %v1837_v21 = vpop.f32.mrf.mxu1  ;;  %1864 = vmatprep.subr.mxu0 %v2009_v2 }
  0xee   :  { %1865 = vmatpush3.msra.mxu0 %v2180_v22 }
  0xef   :  { %1710 = vmatprep.subr.msk.mxu0 %vm535_vm3, %v521_v27 }
 0x1a1   :  { %v282_v23 = vpop.f32.mrf.mxu0 }
 0x1a2   :  { %v283_v34 = vadd.f32 %v282_v23, %v209_v19 }
 0x1a3   :  { %v1850_v24 = vpop.f32.mrf.mxu0 }
 0x1a5   :  { %v355_v25 = vpop.f32.mrf.mxu0 }
 0x1a6   :  { %1867 = vmatmul.mubr.msk.f32.vlgmr.msra.gmra.mxu0 %vm139_vm2, %v355_v25 }
 0x1a7   :  { %v1855_v26 = vpop.f32.mrf.mxu0  ;;  %686 = vmatprep.mubr.f32.mxu0 %v2009_v2  ;;  %1711 = vmatpush1.msk.msra.mxu0 %vm535_vm3, %v520_v28 }
 0x1a8   :  { %648 = vmatprep.subr.mxu0 %v2194_v29 }
 0x1a9   :  { %649 = vmatpush1.msra.mxu0 %v2200_v30 }
 0x1aa   :  { %650 = vmatprep.subr.mxu0 %v2206_v31 }
 0x1ab   :  { %651 = vmatpush1.msra.mxu0 %v2212_v32 }
 0x1ac   :  { %652 = vmatprep.subr.mxu0 %v2218_v33 }
 0x1ad   :  { %653 = vmatpush1.msra.mxu0 %v2313_v51 }
 0x1ae   :  { %1722 = vmatprep.subr.msk.mxu0 %vm535_vm3, %v1721_v52 }
 0x266   :  { %v434_v35 = vpop.f32.mrf.mxu0 }
 0x267   :  { %v438_v37 = vadd.f32 %v434_v35, %v283_v34 }
 0x268   :  { %v1868_v38 = vpop.f32.mrf.mxu0 }
 0x269   :  { %v440_v39 = vadd.f32 %v439_v36, %v438_v37  ;;  %v1749_v37 = vld [vmem:[%s2459_s2 + $0x78] sm:$0x1f] }
 0x26b   :  { %v442_v40 = vmul.f32 0.4, %v440_v39  ;;  %vm441_vm4 = vcmp.ge.f32.partialorder %v440_v39, 0.0 }
 0x26d   :  { %v443_v42 = vsel %vm441_vm4, %v440_v39, %v442_v40  ;;  %v1748_v39 = vld [vmem:[%s2459_s2 + $0x70] sm:$0x1f] }
 0x26e   :  { %1870 = vmatpush3.msra.mxu1 %v443_v42 }
 0x26f   :  { %1872 = vmatmul.mubr.msk.f32.vlgmr.msra.gmra.mxu1 %vm54_vm0, %v2053_v1  ;;  %1707 = vmatprep.subr.msk.mxu1 %vm535_vm3, %v1706_v41 }
 0x270   :  { %1708 = vmatpush1.msk.msra.mxu1 %vm535_vm3, %v1705_v43  ;;  %606 = vmatprep.mubr.f32.mxu1 %v2009_v2 }
 0x271   :  { %568 = vmatprep.subr.mxu1 %v2237_v44 }
 0x272   :  { %569 = vmatpush1.msra.mxu1 %v2245_v45 }
 0x273   :  { %570 = vmatprep.subr.mxu1 %v2251_v46 }
 0x274   :  { %571 = vmatpush1.msra.mxu1 %v2258_v47 }
 0x275   :  { %572 = vmatprep.subr.mxu1 %v2264_v48 }
 0x276   :  { %573 = vmatpush1.msra.mxu1 %v2270_v49 }
 0x277   :  { %1709 = vmatmul.mubr.msk.f32.vlgmr.msra.gmra.mxu1 %vm531_vm5, %v443_v42  ;;  %1874 = vmatprep.subr.mxu1 %v2009_v2 }
 0x278   :  { %1875 = vmatpush3.msra.mxu1 %v443_v42  ;;  %1876 = vmatprep.mubr.msk.f32.mxu1 %vm2010_vm1, %v2009_v2 }
 0x279   :  { %1879 = vmatprep.subr.mxu1 %v2009_v2 }
 0x27b   :  { %1877 = vmatmul.mubr.msk.f32.vlgmr.msra.gmra.mxu1 %vm54_vm0, %v2142_v15 }
 0x27c   :  { %1880 = vmatpush3.msra.mxu1 %v1725_v50  ;;  %1881 = vmatprep.mubr.msk.f32.mxu1 %vm2010_vm1, %v2009_v2 }
 0x27d   :  { %1884 = vmatprep.subr.mxu1 %v2009_v2 }
 0x27f   :  { %1882 = vmatmul.mubr.msk.f32.vlgmr.msra.gmra.mxu1 %vm54_vm0, %v2053_v1 }
 0x280   :  { %1885 = vmatpush3.msra.mxu1 %v2061_v3  ;;  %1894 = vmatprep.mubr.msk.f32.mxu1 %vm2010_vm1, %v2009_v2 }
 0x281   :  { %1886 = vmatprep.subr.mxu1 %v2009_v2 }
 0x282   :  { %1887 = vmatpush3.msra.mxu1 %v2075_v5 }
 0x283   :  { %1888 = vmatprep.subr.mxu1 %v2009_v2 }
 0x284   :  { %1889 = vmatpush3.msra.mxu1 %v2089_v7 }
 0x285   :  { %1890 = vmatprep.subr.mxu1 %v2009_v2 }
 0x286   :  { %1891 = vmatpush3.msra.mxu1 %v2103_v9 }
 0x287   :  { %1892 = vmatprep.subr.mxu1 %v2009_v2 }
 0x288   :  { %1893 = vmatpush3.msra.mxu1 %v2125_v11  ;;  %v1323_v11 = vld [vmem:[%s2459_s2 + $0x30] sm:$0x1f] }
 0x289   :  { %1895 = vmatmul.mubr.msk.f32.vlgmr.msra.gmra.mxu1 %vm139_vm2, %v1725_v50  ;;  %1910 = vmatprep.subr.mxu1 %v2009_v2 }
 0x28a   :  { %1911 = vmatpush3.msra.mxu1 %v1725_v50  ;;  %1912 = vmatprep.mubr.msk.f32.mxu1 %vm2010_vm1, %v2009_v2 }
 0x28b   :  { %1928 = vmatprep.subr.mxu1 %v2009_v2 }
 0x28d   :  { %1913 = vmatmul.mubr.msk.f32.vlgmr.msra.gmra.mxu1 %vm54_vm0, %v2142_v15 }
 0x28e   :  { %1930 = vmatprep.mubr.msk.f32.mxu1 %vm2010_vm1, %v2009_v2 }
 0x32f   :  { %v510_v54 = vpop.f32.mrf.mxu1 }
 0x330   :  { %1712 = vmatmul.mubr.msk.f32.vlgmr.msra.gmra.mxu0 %vm531_vm5, %v510_v54 }
 0x331   :  { %v1873_v57 = vpop.f32.mrf.mxu1  ;;  %1723 = vmatpush1.msk.msra.mxu0 %vm535_vm3, %v1720_v53  ;;  %845 = vmatprep.mubr.f32.mxu0 %v2009_v2 }
 0x332   :  { %807 = vmatprep.subr.mxu0 %v2326_v55 }
 0x333   :  { %808 = vmatpush1.msra.mxu0 %v2332_v56 }
 0x334   :  { %809 = vmatprep.subr.mxu0 %v2338_v58 }
 0x335   :  { %810 = vmatpush1.msra.mxu0 %v2345_v59 }
 0x336   :  { %811 = vmatprep.subr.mxu0 %v2351_v60 }
 0x337   :  { %v608_v62 = vpop.f32.mrf.mxu1  ;;  %812 = vmatpush1.msra.mxu0 %v2357_v61 }
 0x338   :  { %1897 = vmatprep.subr.mxu0 %v2009_v2 }
 0x339   :  { %v610_v63 = vpop.f32.mrf.mxu1 }
 0x33b   :  { %v759_v0 = vpop.f32.mrf.mxu1 }
 0x33c   :  { %1724 = vmatmul.mubr.msk.f32.vlgmr.msra.gmra.mxu0 %vm531_vm5, %v759_v0 }
 0x33d   :  { %1898 = vmatpush3.msra.mxu0 %v2066_v4  ;;  %v1878_v3 = vpop.f32.mrf.mxu1  ;;  %1907 = vmatprep.mubr.msk.f32.mxu0 %vm2010_vm1, %v2009_v2 }
 0x33e   :  { %1899 = vmatprep.subr.mxu0 %v2009_v2 }
 0x33f   :  { %1900 = vmatpush3.msra.mxu0 %v2080_v6  ;;  %v934_v5 = vpop.f32.mrf.mxu1 }
 0x340   :  { %1901 = vmatprep.subr.mxu0 %v2009_v2 }
 0x341   :  { %1902 = vmatpush3.msra.mxu0 %v2094_v8  ;;  %v1883_v7 = vpop.f32.mrf.mxu1 }
 0x342   :  { %1903 = vmatprep.subr.mxu0 %v2009_v2 }
 0x343   :  { %1904 = vmatpush3.msra.mxu0 %v2108_v10  ;;  %v1324_v10 = vld [vmem:[%s2459_s2 + $0x38] sm:$0x1f] }
 0x344   :  { %1905 = vmatprep.subr.mxu0 %v2009_v2 }
 0x345   :  { %1906 = vmatpush3.msra.mxu0 %v2130_v12 }
 0x346   :  { %1908 = vmatmul.mubr.msk.f32.vlgmr.msra.gmra.mxu0 %vm139_vm2, %v934_v5  ;;  %1915 = vmatprep.subr.mxu0 %v2009_v2 }
 0x347   :  { %1916 = vmatpush3.msra.mxu0 %v2148_v16  ;;  %1925 = vmatprep.mubr.msk.f32.mxu0 %vm2010_vm1, %v2009_v2 }
 0x348   :  { %1917 = vmatprep.subr.mxu0 %v2009_v2 }
 0x349   :  { %v1017_v4 = vpop.f32.mrf.mxu1  ;;  %1918 = vmatpush3.msra.mxu0 %v2155_v17  ;;  %v2404_v17 = vstv %s1682_s7 }
 0x34a   :  { %1919 = vmatprep.subr.mxu0 %v2009_v2 }
 0x34b   :  { %v1896_v6 = vpop.f32.mrf.mxu1  ;;  %1920 = vmatpush3.msra.mxu0 %v2166_v18 }
 0x34c   :  { %1921 = vmatprep.subr.mxu0 %v2009_v2 }
 0x34d   :  { %v1160_v8 = vpop.f32.mrf.mxu1  ;;  %1922 = vmatpush3.msra.mxu0 %v2173_v20 }
 0x34e   :  { %1923 = vmatprep.subr.mxu0 %v2009_v2 }
 0x34f   :  { %v1914_v9 = vpop.f32.mrf.mxu1  ;;  %1924 = vmatpush3.msra.mxu0 %v2180_v22 }
 0x350   :  { %1926 = vmatmul.mubr.msk.f32.vlgmr.msra.gmra.mxu0 %vm139_vm2, %v1160_v8  ;;  %1753 = vmatprep.subr.msk.mxu0 %vm535_vm3, %v1324_v10 }
 0x351   :  { %1486 = vmatprep.mubr.f32.mxu0 %v2009_v2  ;;  %1754 = vmatpush1.msk.msra.mxu0 %vm535_vm3, %v1323_v11 }
 0x352   :  { %1448 = vmatprep.subr.mxu0 %v2194_v29 }
 0x353   :  { %1449 = vmatpush1.msra.mxu0 %v2200_v30 }
 0x354   :  { %1450 = vmatprep.subr.mxu0 %v2206_v31 }
 0x355   :  { %1451 = vmatpush1.msra.mxu0 %v2212_v32 }
 0x356   :  { %1452 = vmatprep.subr.mxu0 %v2218_v33 }
 0x357   :  { %1453 = vmatpush1.msra.mxu0 %v2313_v51 }
 0x3f0   :  { %v688_v12 = vpop.f32.mrf.mxu0 }
 0x3f1   :  { %v689_v14 = vadd.f32 %v688_v12, %v608_v62 }
 0x3f2   :  { %v690_v13 = vpop.f32.mrf.mxu0 }
 0x3f3   :  { %v691_v18 = vadd.f32 %v690_v13, %v610_v63 }
 0x3fc   :  { %v847_v16 = vpop.f32.mrf.mxu0 }
 0x3fd   :  { %v852_v19 = vadd.f32 %v847_v16, %v689_v14 }
 0x3fe   :  { %v849_v20 = vpop.f32.mrf.mxu0 }
 0x3ff   :  { %v855_v21 = vadd.f32 %v2404_v17, %v852_v19  ;;  %v853_v22 = vadd.f32 %v849_v20, %v691_v18 }
 0x401   :  { %vm857_vm6 = vcmp.ge.f32.partialorder %v855_v21, 0.0  ;;  %v859_v23 = vmul.f32 0.4, %v855_v21  ;;  %v856_v24 = vadd.f32 %v2404_v17, %v853_v22 }
 0x403   :  { %v861_v25 = vsel %vm857_vm6, %v855_v21, %v859_v23  ;;  %vm858_vm7 = vcmp.ge.f32.partialorder %v856_v24, 0.0  ;;  %v860_v26 = vmul.f32 0.4, %v856_v24 }
 0x404   :  { %863 = vst [vmem:[#allocation7] sm:$0xff] %v861_v25 }
 0x405   :  { %v862_v27 = vsel %vm858_vm7, %v856_v24, %v860_v26 }
 0x406   :  { %865 = vst.msk [vmem:[#allocation7 + $0x8] sm:$0xff] %vm864_vm8, %v862_v27  ;;  %v1090_v28 = vpop.f32.mrf.mxu0 }
 0x407   :  { %v1091_v30 = vadd.f32 %v1090_v28, %v1017_v4 }
 0x408   :  { %v1909_v29 = vpop.f32.mrf.mxu0 }
 0x410   :  { %v1238_v31 = vpop.f32.mrf.mxu0 }
 0x411   :  { %v1242_v32 = vadd.f32 %v1238_v31, %v1091_v30 }
 0x412   :  { %v1927_v33 = vpop.f32.mrf.mxu0 }
 0x413   :  { %v1243_v34 = vadd.f32 %v1242_v32, %v439_v36  ;;  %v1763_v36 = vld [vmem:[%s2459_s2 + $0xb0] sm:$0x1f] }
 0x415   :  { %v1245_v35 = vmul.f32 0.4, %v1243_v34  ;;  %vm1244_vm9 = vcmp.ge.f32.partialorder %v1243_v34, 0.0 }
 0x417   :  { %v1246_v38 = vsel %vm1244_vm9, %v1243_v34, %v1245_v35 }
 0x418   :  { %1929 = vmatpush3.msra.mxu1 %v1246_v38 }
 0x419   :  { %1931 = vmatmul.mubr.msk.f32.vlgmr.msra.gmra.mxu1 %vm54_vm0, %v2053_v1  ;;  %1750 = vmatprep.subr.msk.mxu1 %vm535_vm3, %v1749_v37  ;;  %v1764_v1 = vld [vmem:[%s2459_s2 + $0xb8] sm:$0x1f]  ;;  %s2011_s2 = smov [#allocation7]  }
 0x41a   :  { %1751 = vmatpush1.msk.msra.mxu1 %vm535_vm3, %v1748_v39  ;;  %1406 = vmatprep.mubr.f32.mxu1 %v2009_v2  ;;  %s1669_s13 = sshll.u32 %s2011_s2, 4  ;;  %s1670_s13 = int_to_ptr.vmem [resolvable:$true] %s1669_s13 }
 0x41b   :  { %1368 = vmatprep.subr.mxu1 %v2237_v44  ;;  %s1979_s14 = scalar_lea.vmem %s1670_s13, 512  ;;  %p1984_p11 = scmp.lt.s32.totalorder %s1670_s13, %s1670_s13 }
 0x41c   :  { %1369 = vmatpush1.msra.mxu1 %v2245_v45  ;;  %p1980_p10 = scmp.ne.s32.totalorder %s1670_s13, %s1979_s14  ;;  %p1985_p12 = scmp.lt.s32.totalorder %s1979_s14, %s1979_s14 }
 0x41d   :  { %1370 = vmatprep.subr.mxu1 %v2251_v46 }
 0x41e   :  { %1371 = vmatpush1.msra.mxu1 %v2258_v47  ;;  %p1986_p13 = por %p1985_p12, %p1984_p11 }
 0x41f   :  { %1372 = vmatprep.subr.mxu1 %v2264_v48 }
 0x420   :  { %1373 = vmatpush1.msra.mxu1 %v2270_v49  ;;  %p1987_p0 = pnand %p1986_p13, %p1980_p10 }
 0x421   :  { %1752 = vmatmul.mubr.msk.f32.vlgmr.msra.gmra.mxu1 %vm531_vm5, %v1246_v38  ;;  %1933 = vmatprep.subr.mxu1 %v2009_v2 }
 0x422   :  { %1934 = vmatpush3.msra.mxu1 %v1246_v38  ;;  %1935 = vmatprep.mubr.msk.f32.mxu1 %vm2010_vm1, %v2009_v2 }
 0x423   :  { %1765 = vmatprep.subr.msk.mxu1 %vm535_vm3, %v1764_v1 }
 0x425   :  { %1936 = vmatmul.mubr.msk.f32.vlgmr.msra.gmra.mxu1 %vm54_vm0, %v2142_v15 }
 0x426   :  { %1644 = vmatprep.mubr.f32.mxu1 %v2009_v2  ;;  %1766 = vmatpush1.msk.msra.mxu1 %vm535_vm3, %v1763_v36 }
 0x427   :  { %1606 = vmatprep.subr.mxu1 %v2326_v55 }
 0x428   :  { %1607 = vmatpush1.msra.mxu1 %v2332_v56 }
 0x429   :  { %1608 = vmatprep.subr.mxu1 %v2338_v58 }
 0x42a   :  { %1609 = vmatpush1.msra.mxu1 %v2345_v59 }
 0x42b   :  { %1610 = vmatprep.subr.mxu1 %v2351_v60 }
 0x42c   :  { %1611 = vmatpush1.msra.mxu1 %v2357_v61 }
 0x4d9   :  { %v1313_v2 = vpop.f32.mrf.mxu1 }
 0x4da   :  { %1755 = vmatmul.mubr.msk.f32.vlgmr.msra.gmra.mxu0 %vm531_vm5, %v1313_v2 }
 0x4db   :  { %v1932_v15 = vpop.f32.mrf.mxu1 }
 0x4e1   :  { %v1408_v40 = vpop.f32.mrf.mxu1 }
 0x4e3   :  { %v1410_v41 = vpop.f32.mrf.mxu1 }
 0x4e5   :  { %v1559_v42 = vpop.f32.mrf.mxu1 }
 0x4e6   :  { %1767 = vmatmul.mubr.msk.f32.vlgmr.msra.gmra.mxu1 %vm531_vm5, %v1559_v42 }
 0x4e7   :  { %v1937_v43 = vpop.f32.mrf.mxu1 }
 0x59a   :  { %v1488_v44 = vpop.f32.mrf.mxu0 }
 0x59b   :  { %v1489_v46 = vadd.f32 %v1488_v44, %v1408_v40 }
 0x59c   :  { %v1490_v45 = vpop.f32.mrf.mxu0 }
 0x59d   :  { %v1491_v48 = vadd.f32 %v1490_v45, %v1410_v41 }
 0x5a6   :  { %v1646_v47 = vpop.f32.mrf.mxu1 }
 0x5a7   :  { %v1651_v49 = vadd.f32 %v1646_v47, %v1489_v46 }
 0x5a8   :  { %v1648_v50 = vpop.f32.mrf.mxu1 }
 0x5a9   :  { %v1653_v51 = vadd.f32 %v1651_v49, %v2404_v17  ;;  %v1652_v52 = vadd.f32 %v1648_v50, %v1491_v48 }
 0x5ab   :  { %vm1655_vm10 = vcmp.ge.f32.partialorder %v1653_v51, 0.0  ;;  %v1657_v53 = vmul.f32 0.4, %v1653_v51  ;;  %v1654_v54 = vadd.f32 %v1652_v52, %v2404_v17 }
 0x5ad   :  { %v1659_v55 = vsel %vm1655_vm10, %v1653_v51, %v1657_v53  ;;  %vm1656_vm11 = vcmp.ge.f32.partialorder %v1654_v54, 0.0  ;;  %v1658_v56 = vmul.f32 0.4, %v1654_v54 }
 0x5ae   :  { %1662 = vst [vmem:[#allocation7 + $0x10] sm:$0xff] %v1659_v55 }
 0x5af   :  { %v1660_v57 = vsel %vm1656_vm11, %v1654_v54, %v1658_v56 }
 0x5b0   :  { %1663 = vst.msk [vmem:[#allocation7 + $0x18] sm:$0xff] %vm864_vm8, %v1660_v57 }
 0x5b1   :  { %1990 = shalt.err (!%p1987_p0)
}
 0x5b2   :  { %s2012_s15 = smov 256   ;;  %s2013_s16 = smov 16  }
 0x5b3   :  { %1675 = dma.vmem_to_hbm [thread:$0]  %s1670_s13, 512, %s2462_s5, [#allocation4], %s2012_s15, %s2012_s15, %s2013_s16  }
 0x5b4   :  { %2003 = dma.done.wait [#allocation4], 512  }
 0x5b5   :  { %2004 = vsyncadd [#allocation4], 4294966784 }
 0x5b6   :  { %1679 = vsyncpa [#allocation3], 1 }
 0x5b7   :  { %1680 = vsyncpa [#allocation4], 1 }
 0x5b8   :  { %1681 = vsyncpa [#allocation5], 1 }

</bundles_post_ra>
